<compile_context>
chip_gen: v6e
topology: v6e:2x2x1
jax: 0.10.0
libtpu: 0.0.40
codegen_flags: <defaults>
</compile_context>

<pallas_src>
import functools

import jax
import jax.numpy as jnp
from jax.experimental import pallas as pl
from jax.experimental.pallas import tpu as pltpu

EPSILON = 1e-07
_NEG_INF = -1e30          # python float -> jaxpr literal (NOT a captured const)


def _round_up(x, m):
    return ((x + m - 1) // m) * m


def _policy_kernel(obs_ref, w1_ref, w2_ref, wh_ref, bias_ref, out_ref, *,
                   action_dim, n_params, head_specs, mxu_dtype):
    h_pad = w1_ref.shape[1]
    h2_pad = w2_ref.shape[1]
    out_pad = wh_ref.shape[1]

    # conv1 + ReLU  (obs cast to MXU dtype in-kernel; elementwise math in f32)
    h1 = jnp.dot(obs_ref[...].astype(mxu_dtype), w1_ref[...],
                 preferred_element_type=jnp.float32)
    h1 = jnp.maximum(h1 + bias_ref[0:1, :h_pad], 0.0)
    # conv2 + ReLU
    h2 = jnp.dot(h1.astype(mxu_dtype), w2_ref[...],
                 preferred_element_type=jnp.float32)
    h2 = jnp.maximum(h2 + bias_ref[1:2, :h2_pad], 0.0)
    # single fused head matmul: action logits + all param-head logits
    logits = jnp.dot(h2.astype(mxu_dtype), wh_ref[...],
                     preferred_element_type=jnp.float32) + bias_ref[2:3, :out_pad]

    B, P = logits.shape
    col = jax.lax.broadcasted_iota(jnp.int32, (B, P), 1)

    # --- softmax over the action lanes only (dim=1 of the torch module) ---
    act_mask = col < action_dim
    a_logits = jnp.where(act_mask, logits, _NEG_INF)
    m = jnp.max(a_logits, axis=-1, keepdims=True)
    e = jnp.where(act_mask, jnp.exp(a_logits - m), 0.0)
    inv = pl.reciprocal(jnp.sum(e, axis=-1, keepdims=True), approx=True)
    probs = e * inv                                   # zeros outside action lanes

    # --- per-interval param heads: argmax (discrete) / eps-clamp (continuous).
    # Values are collected and written once after the loop.
    vals = []
    off = action_dim
    for (is_discrete, sz, lo, hi) in head_specs:
        head_mask = (col >= off) & (col < off + sz)
        if is_discrete:
            # argmax of the head logits (softmax is monotone -> dropped);
            # first-occurrence tie-break via min over matching indices.
            # TODO(synk): if discrete heads multiply, fuse the two XLU
            # reductions per head into one segmented reduction.
            hmax = jnp.max(jnp.where(head_mask, logits, _NEG_INF),
                           axis=-1, keepdims=True)
            is_max = head_mask & (logits == hmax)
            cand = jnp.where(is_max, (col - off).astype(jnp.float32), float(P))
            vals.append(jnp.min(cand, axis=-1, keepdims=True))          # (B, 1)
        else:
            # single-logit head: extract via masked sum, clamp to [lo, hi]
            # exactly like torch.max(torch.min(x, hi), lo).
            v = jnp.sum(jnp.where(head_mask, logits, 0.0),
                        axis=-1, keepdims=True)                         # (B, 1)
            vals.append(jnp.maximum(jnp.minimum(v, hi), lo))
        off += sz

    out_ref[...] = probs                 # one unmasked lane-dense (B, out_pad) store
    if n_params:
        # single combined write of all param lanes
        out_ref[:, action_dim:action_dim + n_params] = jnp.concatenate(vals, axis=-1)


def _fused_forward(obs, w1, w2, wh, biases, *, action_dim, n_params,
                   head_specs, mxu_dtype):
    B, state_dim = obs.shape
    out_pad = wh.shape[1]

    # Batch tiling: sublane-dense tiles, weights VMEM-resident across the grid.
    tb = 256 if B > 256 else _round_up(B, 8)
    b_pad = _round_up(B, tb)
    if b_pad != B:
        obs = jnp.pad(obs, ((0, b_pad - B), (0, 0)))

    kernel = functools.partial(
        _policy_kernel, action_dim=action_dim, n_params=n_params,
        head_specs=head_specs, mxu_dtype=mxu_dtype)

    out = pl.pallas_call(
        kernel,
        out_shape=jax.ShapeDtypeStruct((b_pad, out_pad), jnp.float32),
        grid_spec=pltpu.PrefetchScalarGridSpec(
            num_scalar_prefetch=0,
            grid=(b_pad // tb,),
            in_specs=[
                pl.BlockSpec((tb, state_dim), lambda i: (i, 0)),   # obs: per-tile
                pl.BlockSpec(w1.shape, lambda i: (0, 0)),          # weights: resident
                pl.BlockSpec(w2.shape, lambda i: (0, 0)),
                pl.BlockSpec(wh.shape, lambda i: (0, 0)),
                pl.BlockSpec(biases.shape, lambda i: (0, 0)),
            ],
            out_specs=pl.BlockSpec((tb, out_pad), lambda i: (i, 0)),
        ),
        compiler_params=pltpu.CompilerParams(
            dimension_semantics=("parallel",)),
    )(obs, w1, w2, wh, biases)
    return out[:B] if b_pad != B else out


def _raw_linear(key, fan_in, fan_out):
    """PyTorch-Linear-style init: U(-1/sqrt(fan_in), 1/sqrt(fan_in))."""
    kw, kb = jax.random.split(key)
    bound = 1.0 / (fan_in ** 0.5)
    w = jax.random.uniform(kw, (fan_in, fan_out), jnp.float32, -bound, bound)
    b = jax.random.uniform(kb, (1, fan_out), jnp.float32, -bound, bound)
    return w, b


def _pad2(x, rows, cols):
    r, c = x.shape
    return jnp.pad(x, ((0, rows - r), (0, cols - c)))


class SimplePolicyNetPallas:
    """JAX/Pallas re-implementation of SimplePolicyNet (extra_params branch)."""

    def __init__(self, key, state_dim, hidden_dim, action_dim, extra_params,
                 mxu_dtype=jnp.float32):
        # TODO(synk): the extra_params=None branch (softmax over dim=0) is not
        # implemented here; only the richer extra_params branch is.
        assert extra_params is not None
        self.action_dim = action_dim
        self.param_intervals = extra_params
        self.n_params = len(extra_params)
        self.mxu_dtype = mxu_dtype

        h2_dim = hidden_dim // 2
        ks = jax.random.split(key, 3 + len(extra_params))

        w1, b1 = _raw_linear(ks[0], state_dim, hidden_dim)
        w2, b2 = _raw_linear(ks[1], hidden_dim, h2_dim)
        wa, ba = _raw_linear(ks[2], h2_dim, action_dim)

        # Per-interval heads; static info folded into (is_discrete, sz, lo, hi).
        head_specs = []
        ws, bs = [wa], [ba]
        for i, interval in enumerate(extra_params):
            if interval[0]:
                sz = int(interval[2] - interval[1] + 1)
                head_specs.append((True, sz, 0.0, 0.0))
            else:
                sz = 1
                hi = float(interval[2]) - (EPSILON if not interval[4] else 0.0)
                lo = float(interval[1]) + (EPSILON if not interval[3] else 0.0)
                head_specs.append((False, sz, lo, hi))
            wp_i, bp_i = _raw_linear(ks[3 + i], h2_dim, sz)
            ws.append(wp_i)
            bs.append(bp_i)
        self.head_specs = tuple(head_specs)

        wh = jnp.concatenate(ws, axis=1)   # (h2_dim, action_dim + p_total)
        bh = jnp.concatenate(bs, axis=1)
        head_w = wh.shape[1]

        # Pad contraction dims only to the sublane pack (8 f32 / 16 bf16); the
        # fused-head lane dim is padded to 128 for the unmasked output store.
        sub = 16 if mxu_dtype == jnp.bfloat16 else 8
        h_pad = _round_up(hidden_dim, sub)
        h2_pad = _round_up(h2_dim, sub)
        out_pad = _round_up(head_w, 128)
        self.out_pad = out_pad

        self.w1 = _pad2(w1, state_dim, h_pad).astype(mxu_dtype)
        self.w2 = _pad2(w2, h_pad, h2_pad).astype(mxu_dtype)
        self.wh = _pad2(wh, h2_pad, out_pad).astype(mxu_dtype)

        # All biases packed into one f32 buffer -> fewer input DMA descriptors.
        bmax = max(h_pad, h2_pad, out_pad)
        biases = jnp.zeros((3, bmax), jnp.float32)
        biases = biases.at[0, :hidden_dim].set(b1[0])
        biases = biases.at[1, :h2_dim].set(b2[0])
        biases = biases.at[2, :head_w].set(bh[0])
        self.biases = biases

    def __call__(self, observation):
        out = _fused_forward(
            observation, self.w1, self.w2, self.wh, self.biases,
            action_dim=self.action_dim, n_params=self.n_params,
            head_specs=self.head_specs, mxu_dtype=self.mxu_dtype,
        )
        actions = out[:, :self.action_dim]
        # Param scalars computed in-kernel (argmax / eps-clamp). As in the
        # torch module's .item() glue, params are taken from row 0.
        params = out[0, self.action_dim:self.action_dim + self.n_params]
        return actions, params

    def reference(self, observation):
        """Pure-JAX reference (same padded params) for correctness checking."""
        w1 = self.w1.astype(jnp.float32)
        w2 = self.w2.astype(jnp.float32)
        wh = self.wh.astype(jnp.float32)
        h1 = jax.nn.relu(observation @ w1 + self.biases[0:1, :w1.shape[1]])
        h2 = jax.nn.relu(h1 @ w2 + self.biases[1:2, :w2.shape[1]])
        logits = h2 @ wh + self.biases[2:3, :wh.shape[1]]
        actions = jax.nn.softmax(logits[:, :self.action_dim], axis=1)
        params, off = [], self.action_dim
        for (is_discrete, sz, lo, hi) in self.head_specs:
            head = logits[0, off:off + sz]
            if is_discrete:
                params.append(jnp.argmax(head).astype(jnp.float32))
            else:
                params.append(jnp.clip(head[0], lo, hi))
            off += sz
        return actions, jnp.stack(params)


if __name__ == "__main__":
    # Small shapes consistent with the module; batched observations amortize
    # the fixed per-call cost (the torch .item() glue corresponds to row 0).
    state_dim, hidden_dim, action_dim = 32, 32, 8
    extra_params = [
        [1, 0, 7, 1, 1],       # discrete interval  -> head with 8 logits, argmax
        [0, -1.0, 1.0, 0, 0],  # continuous interval -> 1 logit, eps-clamped
    ]
    batch = 8

    key = jax.random.PRNGKey(0)
    k_net, k_obs = jax.random.split(key)
    net = SimplePolicyNetPallas(k_net, state_dim, hidden_dim, action_dim,
                                extra_params)
    observation = jax.random.normal(k_obs, (batch, state_dim), jnp.float32)

    actions, params = net(observation)
    jax.block_until_ready((actions, params))

    assert actions.shape == (batch, action_dim)
    assert params.shape == (len(extra_params),)

    # softmax rows sum to 1 (tolerance covers the approx EUP reciprocal)
    assert float(jnp.max(jnp.abs(jnp.sum(actions, axis=1) - 1.0))) < 5e-3
    # discrete param head (8 logits) -> integer argmax index in [0, 7]
    p0 = float(params[0])
    assert 0.0 <= p0 <= 7.0 and abs(p0 - round(p0)) < 1e-5
    # continuous param clamped to [-1 + eps, 1 - eps]
    assert -1.0 <= float(params[1]) <= 1.0

    # pure-JAX reference check
    ref_actions, ref_params = net.reference(observation)
    assert float(jnp.max(jnp.abs(actions - ref_actions))) < 5e-3
    assert float(jnp.max(jnp.abs(params - ref_params))) < 1e-3

    print("KERNEL_OK")
</pallas_src>

<mosaic_0001>
module attributes {stable_mosaic.version = 11 : i64} {
  func.func @_policy_kernel(%arg0: i32, %arg1: memref<8x32xf32, #tpu.memory_space<vmem>>, %arg2: memref<32x32xf32, #tpu.memory_space<vmem>>, %arg3: memref<32x16xf32, #tpu.memory_space<vmem>>, %arg4: memref<16x128xf32, #tpu.memory_space<vmem>>, %arg5: memref<3x128xf32, #tpu.memory_space<vmem>>, %arg6: memref<8x128xf32, #tpu.memory_space<vmem>>) attributes {dimension_semantics = [#tpu.dimension_semantics<parallel>], iteration_bounds = array<i64: 1>, scalar_prefetch = 0 : i64, scratch_operands = 0 : i64, tpu.core_type = #tpu.core_type<tc>, window_params = [{transform_indices = @transform_0, window_bounds = array<i64: 8, 32>}, {pipeline_mode = #tpu.pipeline_mode<synchronous>, transform_indices = @transform_1, window_bounds = array<i64: 32, 32>}, {pipeline_mode = #tpu.pipeline_mode<synchronous>, transform_indices = @transform_2, window_bounds = array<i64: 32, 16>}, {pipeline_mode = #tpu.pipeline_mode<synchronous>, transform_indices = @transform_3, window_bounds = array<i64: 16, 128>}, {pipeline_mode = #tpu.pipeline_mode<synchronous>, transform_indices = @transform_4, window_bounds = array<i64: 3, 128>}, {transform_indices = @transform_5, window_bounds = array<i64: 8, 128>}]} {
    %c0 = arith.constant 0 : index
    %c0_0 = arith.constant 0 : index
    %0 = vector.load %arg1[%c0, %c0_0] : memref<8x32xf32, #tpu.memory_space<vmem>>, vector<8x32xf32>
    %c0_1 = arith.constant 0 : index
    %c0_2 = arith.constant 0 : index
    %1 = vector.load %arg2[%c0_1, %c0_2] : memref<32x32xf32, #tpu.memory_space<vmem>>, vector<32x32xf32>
    %cst = arith.constant dense<0.000000e+00> : vector<8x32xf32>
    %2 = tpu.matmul %0, %1, %cst {dimension_numbers = #tpu.dot_dimension_numbers<[1], [0], [0], [1], [0, 0, 1, 1], [], []>} : vector<8x32xf32>, vector<32x32xf32>, vector<8x32xf32> -> vector<8x32xf32>
    %c0_3 = arith.constant 0 : index
    %c0_4 = arith.constant 0 : index
    %3 = vector.load %arg5[%c0_3, %c0_4] : memref<3x128xf32, #tpu.memory_space<vmem>>, vector<1x32xf32>
    %4 = vector.broadcast %3 : vector<1x32xf32> to vector<8x32xf32>
    %5 = arith.addf %2, %4 : vector<8x32xf32>
    %cst_5 = arith.constant 0.000000e+00 : f32
    %6 = vector.broadcast %cst_5 : f32 to vector<8x32xf32>
    %7 = arith.maximumf %5, %6 : vector<8x32xf32>
    %c0_6 = arith.constant 0 : index
    %c0_7 = arith.constant 0 : index
    %8 = vector.load %arg3[%c0_6, %c0_7] : memref<32x16xf32, #tpu.memory_space<vmem>>, vector<32x16xf32>
    %cst_8 = arith.constant dense<0.000000e+00> : vector<8x16xf32>
    %9 = tpu.matmul %7, %8, %cst_8 {dimension_numbers = #tpu.dot_dimension_numbers<[1], [0], [0], [1], [0, 0, 1, 1], [], []>} : vector<8x32xf32>, vector<32x16xf32>, vector<8x16xf32> -> vector<8x16xf32>
    %c1 = arith.constant 1 : index
    %c0_9 = arith.constant 0 : index
    %10 = vector.load %arg5[%c1, %c0_9] : memref<3x128xf32, #tpu.memory_space<vmem>>, vector<1x16xf32>
    %11 = vector.broadcast %10 : vector<1x16xf32> to vector<8x16xf32>
    %12 = arith.addf %9, %11 : vector<8x16xf32>
    %cst_10 = arith.constant 0.000000e+00 : f32
    %13 = vector.broadcast %cst_10 : f32 to vector<8x16xf32>
    %14 = arith.maximumf %12, %13 : vector<8x16xf32>
    %c0_11 = arith.constant 0 : index
    %c0_12 = arith.constant 0 : index
    %15 = vector.load %arg4[%c0_11, %c0_12] : memref<16x128xf32, #tpu.memory_space<vmem>>, vector<16x128xf32>
    %cst_13 = arith.constant dense<0.000000e+00> : vector<8x128xf32>
    %16 = tpu.matmul %14, %15, %cst_13 {dimension_numbers = #tpu.dot_dimension_numbers<[1], [0], [0], [1], [0, 0, 1, 1], [], []>} : vector<8x16xf32>, vector<16x128xf32>, vector<8x128xf32> -> vector<8x128xf32>
    %c2 = arith.constant 2 : index
    %c0_14 = arith.constant 0 : index
    %17 = vector.load %arg5[%c2, %c0_14] : memref<3x128xf32, #tpu.memory_space<vmem>>, vector<1x128xf32>
    %18 = vector.broadcast %17 : vector<1x128xf32> to vector<8x128xf32>
    %19 = arith.addf %16, %18 : vector<8x128xf32>
    %20 = tpu.iota {dimensions = array<i32: 1>} : vector<8x128xi32>
    %c8_i32 = arith.constant 8 : i32
    %21 = vector.broadcast %c8_i32 : i32 to vector<8x128xi32>
    %22 = arith.cmpi slt, %20, %21 : vector<8x128xi32>
    %cst_15 = arith.constant -1.000000e+30 : f32
    %23 = vector.broadcast %cst_15 : f32 to vector<8x128xf32>
    %24 = arith.select %22, %19, %23 : vector<8x128xi1>, vector<8x128xf32>
    %cst_16 = arith.constant dense<0xFF800000> : vector<8xf32>
    %25 = vector.multi_reduction <maximumf>, %24, %cst_16 [1] : vector<8x128xf32> to vector<8xf32>
    %26 = vector.shape_cast %25 : vector<8xf32> to vector<8x1xf32>
    %27 = vector.broadcast %26 : vector<8x1xf32> to vector<8x128xf32>
    %28 = arith.subf %24, %27 : vector<8x128xf32>
    %29 = math.exp %28 : vector<8x128xf32>
    %cst_17 = arith.constant 0.000000e+00 : f32
    %30 = vector.broadcast %cst_17 : f32 to vector<8x128xf32>
    %31 = arith.select %22, %29, %30 : vector<8x128xi1>, vector<8x128xf32>
    %cst_18 = arith.constant dense<0.000000e+00> : vector<8xf32>
    %32 = vector.multi_reduction <add>, %31, %cst_18 [1] : vector<8x128xf32> to vector<8xf32>
    %33 = vector.shape_cast %32 : vector<8xf32> to vector<8x1xf32>
    %34 = tpu.reciprocal %33 {approx = true} : vector<8x1xf32> -> vector<8x1xf32>
    %35 = vector.broadcast %34 : vector<8x1xf32> to vector<8x128xf32>
    %36 = arith.mulf %31, %35 : vector<8x128xf32>
    %c8_i32_19 = arith.constant 8 : i32
    %37 = vector.broadcast %c8_i32_19 : i32 to vector<8x128xi32>
    %38 = arith.cmpi sge, %20, %37 : vector<8x128xi32>
    %c16_i32 = arith.constant 16 : i32
    %39 = vector.broadcast %c16_i32 : i32 to vector<8x128xi32>
    %40 = arith.cmpi slt, %20, %39 : vector<8x128xi32>
    %41 = arith.andi %38, %40 : vector<8x128xi1>
    %cst_20 = arith.constant -1.000000e+30 : f32
    %42 = vector.broadcast %cst_20 : f32 to vector<8x128xf32>
    %43 = arith.select %41, %19, %42 : vector<8x128xi1>, vector<8x128xf32>
    %cst_21 = arith.constant dense<0xFF800000> : vector<8xf32>
    %44 = vector.multi_reduction <maximumf>, %43, %cst_21 [1] : vector<8x128xf32> to vector<8xf32>
    %45 = vector.shape_cast %44 : vector<8xf32> to vector<8x1xf32>
    %46 = vector.broadcast %45 : vector<8x1xf32> to vector<8x128xf32>
    %47 = arith.cmpf oeq, %19, %46 : vector<8x128xf32>
    %48 = arith.andi %41, %47 : vector<8x128xi1>
    %c8_i32_22 = arith.constant 8 : i32
    %49 = vector.broadcast %c8_i32_22 : i32 to vector<8x128xi32>
    %50 = arith.subi %20, %49 : vector<8x128xi32>
    %51 = arith.sitofp %50 : vector<8x128xi32> to vector<8x128xf32>
    %cst_23 = arith.constant 1.280000e+02 : f32
    %52 = vector.broadcast %cst_23 : f32 to vector<8x128xf32>
    %53 = arith.select %48, %51, %52 : vector<8x128xi1>, vector<8x128xf32>
    %cst_24 = arith.constant dense<0x7F800000> : vector<8xf32>
    %54 = vector.multi_reduction <minimumf>, %53, %cst_24 [1] : vector<8x128xf32> to vector<8xf32>
    %55 = vector.shape_cast %54 : vector<8xf32> to vector<8x1xf32>
    %c16_i32_25 = arith.constant 16 : i32
    %56 = vector.broadcast %c16_i32_25 : i32 to vector<8x128xi32>
    %57 = arith.cmpi sge, %20, %56 : vector<8x128xi32>
    %c17_i32 = arith.constant 17 : i32
    %58 = vector.broadcast %c17_i32 : i32 to vector<8x128xi32>
    %59 = arith.cmpi slt, %20, %58 : vector<8x128xi32>
    %60 = arith.andi %57, %59 : vector<8x128xi1>
    %cst_26 = arith.constant 0.000000e+00 : f32
    %61 = vector.broadcast %cst_26 : f32 to vector<8x128xf32>
    %62 = arith.select %60, %19, %61 : vector<8x128xi1>, vector<8x128xf32>
    %cst_27 = arith.constant dense<0.000000e+00> : vector<8xf32>
    %63 = vector.multi_reduction <add>, %62, %cst_27 [1] : vector<8x128xf32> to vector<8xf32>
    %64 = vector.shape_cast %63 : vector<8xf32> to vector<8x1xf32>
    %cst_28 = arith.constant 0.99999988 : f32
    %65 = vector.broadcast %cst_28 : f32 to vector<8x1xf32>
    %66 = arith.minimumf %64, %65 : vector<8x1xf32>
    %cst_29 = arith.constant -0.99999988 : f32
    %67 = vector.broadcast %cst_29 : f32 to vector<8x1xf32>
    %68 = arith.maximumf %66, %67 : vector<8x1xf32>
    %c0_30 = arith.constant 0 : index
    %c0_31 = arith.constant 0 : index
    %69 = vector.load %arg6[%c0_30, %c0_31] : memref<8x128xf32, #tpu.memory_space<vmem>>, vector<8x128xf32>
    tpu.vector_store %arg6[%c0_30, %c0_31], %36 {strides = array<i32>} : memref<8x128xf32, #tpu.memory_space<vmem>>, vector<8x128xf32>,
    %70 = tpu.concatenate %55, %68 in 1 : vector<8x1xf32>, vector<8x1xf32> -> vector<8x2xf32>
    %c0_32 = arith.constant 0 : index
    %c8 = arith.constant 8 : index
    %71 = vector.load %arg6[%c0_32, %c8] : memref<8x128xf32, #tpu.memory_space<vmem>>, vector<8x2xf32>
    tpu.vector_store %arg6[%c0_32, %c8], %70 {strides = array<i32>} : memref<8x128xf32, #tpu.memory_space<vmem>>, vector<8x2xf32>,
    return
  }
  func.func @transform_0(%arg0: i32) -> (i32, i32) {
    %c0_i32 = arith.constant 0 : i32
    %c0_i32_0 = arith.constant 0 : i32
    return %arg0, %c0_i32 : i32, i32
  }
  func.func @transform_1(%arg0: i32) -> (i32, i32) {
    %c0_i32 = arith.constant 0 : i32
    %c0_i32_0 = arith.constant 0 : i32
    %c0_i32_1 = arith.constant 0 : i32
    return %c0_i32, %c0_i32_0 : i32, i32
  }
  func.func @transform_2(%arg0: i32) -> (i32, i32) {
    %c0_i32 = arith.constant 0 : i32
    %c0_i32_0 = arith.constant 0 : i32
    %c0_i32_1 = arith.constant 0 : i32
    return %c0_i32, %c0_i32_0 : i32, i32
  }
  func.func @transform_3(%arg0: i32) -> (i32, i32) {
    %c0_i32 = arith.constant 0 : i32
    %c0_i32_0 = arith.constant 0 : i32
    %c0_i32_1 = arith.constant 0 : i32
    return %c0_i32, %c0_i32_0 : i32, i32
  }
  func.func @transform_4(%arg0: i32) -> (i32, i32) {
    %c0_i32 = arith.constant 0 : i32
    %c0_i32_0 = arith.constant 0 : i32
    %c0_i32_1 = arith.constant 0 : i32
    return %c0_i32, %c0_i32_0 : i32, i32
  }
  func.func @transform_5(%arg0: i32) -> (i32, i32) {
    %c0_i32 = arith.constant 0 : i32
    %c0_i32_0 = arith.constant 0 : i32
    return %arg0, %c0_i32 : i32, i32
  }
}

</mosaic_0001>

<bundles_post_ra>
// kernel: tpu_custom_call.1
= control target key start
LH: loop header
LB: loop body
LE: loop exit
PB: predicated region body
PF: predicated region fallthrough
CT: control target
= control target key end

     0   :  { %10 = vsyncpa [#allocation3], 0  ;;  %s529_s0 = inlined_call_operand.hbm [shape: f32[8,32], index: 0, kind: input, shape index: {}]   ;;  %s530_s1 = inlined_call_operand.vmem [shape: f32[32,32], index: 1, kind: input, shape index: {}]   ;;  %s531_s2 = inlined_call_operand.vmem [shape: f32[32,16], index: 2, kind: input, shape index: {}]   ;;  %s532_s3 = inlined_call_operand.vmem [shape: f32[16,128], index: 3, kind: input, shape index: {}]   ;;  %s533_s4 = inlined_call_operand.vmem [shape: f32[3,128], index: 4, kind: input, shape index: {}]   ;;  %s534_s5 = inlined_call_operand.hbm [shape: f32[8,128], index: 5, kind: output, shape index: {}]  }
   0x1   :  { %11 = vsyncpa [#allocation4], 0  ;;  %s444_s18 = smov [#allocation2]  }
   0x2   :  { %s18_s19 = sshll.u32 %s444_s18, 4  ;;  %s19_s19 = int_to_ptr.vmem [resolvable:$true] %s18_s19 }
   0x3   :  { %s408_s20 = scalar_lea.vmem %s19_s19, 128  ;;  %p413_p1 = scmp.lt.s32.totalorder %s19_s19, %s19_s19 }
   0x4   :  { %p409_p0 = scmp.ne.s32.totalorder %s19_s19, %s408_s20  ;;  %p414_p2 = scmp.lt.s32.totalorder %s408_s20, %s408_s20 }
   0x6   :  { %p415_p3 = por %p414_p2, %p413_p1 }
   0x8   :  { %p416_p4 = pnand %p415_p3, %p409_p0 }
   0xa   :  { %419 = shalt.err (!%p416_p4)
}
   0xb   :  { %21 = dma.hbm_to_vmem [thread:$0]  %s529_s0, 128, %s19_s19, [#allocation3]  }
   0xc   :  { %440 = dma.done.wait [#allocation3], 128  }
   0xd   :  { %441 = vsyncadd [#allocation3], 4294967168  ;;  %v445_v0 = vmov 0.0   ;;  %vm446_vm0 = vmmov 0   ;;  %v37_v1 = vld [vmem:[%s530_s1 + $0x18] sm:$0xff]  ;;  %v36_v2 = vld [vmem:[%s530_s1 + $0x10] sm:$0xff]  ;;  %v282_v22 = vlaneseq }
   0xe   :  { %362 = vmatprep.subr.mxu0 %v445_v0  ;;  %370 = vmatprep.mubr.msk.f32.mxu0 %vm446_vm0, %v445_v0  ;;  %v121_v3 = vld [vmem:[%s531_s2 + $0x18] sm:$0xff]  ;;  %v35_v4 = vld [vmem:[%s530_s1 + $0x8] sm:$0xff]  ;;  %v34_v5 = vld [vmem:[%s530_s1] sm:$0xff]  ;;  %vm43_vm1 = vcmask 261120   ;;  %vm208_vm2 = vcmask 130048   ;;  %vm318_vm12 = vcmask 7168  }
   0xf   :  { %373 = vmatprep.subr.mxu1 %v445_v0  ;;  %381 = vmatprep.mubr.msk.f32.mxu1 %vm446_vm0, %v445_v0  ;;  %v33_v6 = vld [vmem:[#allocation2] sm:$0xff]  ;;  %v120_v7 = vld [vmem:[%s531_s2 + $0x10] sm:$0xff]  ;;  %v119_v8 = vld [vmem:[%s531_s2 + $0x8] sm:$0xff]  ;;  %v283_v23 = vand.u32 127, %v282_v22  ;;  %vm324_vm13 = vcmask 80960  }
  0x10   :  { %363 = vmatpush3.msra.mxu0 %v37_v1  ;;  %374 = vmatpush3.msra.mxu1 %v121_v3  ;;  %v118_v9 = vld [vmem:[%s531_s2] sm:$0xff]  ;;  %v202_v15 = vld [vmem:[%s532_s3 + $0x8] sm:$0xff] }
  0x11   :  { %364 = vmatprep.subr.mxu0 %v445_v0  ;;  %375 = vmatprep.subr.mxu1 %v445_v0  ;;  %v341_v10 = vld [vmem:[%s533_s4] ss:$0 sm:$0xff]  ;;  %v343_v17 = vld [vmem:[%s533_s4 + $0x1] ss:$0 sm:$0xff]  ;;  %vm309_vm3 = vcmp.ge.s32.totalorder %v283_v23, 16  ;;  %vm310_vm4 = vcmp.lt.s32.totalorder %v283_v23, 17 }
  0x12   :  { %365 = vmatpush3.msra.mxu0 %v36_v2  ;;  %376 = vmatpush3.msra.mxu1 %v120_v7  ;;  %v201_v16 = vld [vmem:[%s532_s3] sm:$0xff]  ;;  %vm296_vm5 = vcmp.ge.s32.totalorder %v283_v23, 8  ;;  %vm297_vm6 = vcmp.lt.s32.totalorder %v283_v23, 16  ;;  %vm311_vm7 = vmand %vm309_vm3, %vm310_vm4  ;;  %vm284_vm9 = vcmp.lt.s32.totalorder %v283_v23, 8  ;;  %v347_v31 = vadd.s32 4294967288, %v283_v23  ;;  %s447_s3 = smov 8  }
  0x13   :  { %366 = vmatprep.subr.mxu0 %v445_v0  ;;  %377 = vmatprep.subr.mxu1 %v445_v0  ;;  %v345_v24 = vld [vmem:[%s533_s4 + $0x2] ss:$0 sm:$0xff]  ;;  %vm298_vm8 = vmand %vm296_vm5, %vm297_vm6  ;;  %s448_s4 = smov [#allocation5]  }
  0x14   :  { %367 = vmatpush3.msra.mxu0 %v35_v4  ;;  %378 = vmatpush3.msra.mxu1 %v119_v8  ;;  %v305_v32 = vcvt.s32.f32 %v347_v31  ;;  %s332_s21 = sshll.u32 %s448_s4, 4  ;;  %s333_s21 = int_to_ptr.vmem [resolvable:$true] %s332_s21 }
  0x15   :  { %368 = vmatprep.subr.mxu0 %v445_v0  ;;  %379 = vmatprep.subr.mxu1 %v445_v0  ;;  %s420_s22 = scalar_lea.vmem %s333_s21, 128  ;;  %p425_p6 = scmp.lt.s32.totalorder %s333_s21, %s333_s21 }
  0x16   :  { %369 = vmatpush3.msra.mxu0 %v34_v5  ;;  %380 = vmatpush3.msra.mxu1 %v118_v9  ;;  %p421_p5 = scmp.ne.s32.totalorder %s333_s21, %s420_s22  ;;  %p426_p7 = scmp.lt.s32.totalorder %s420_s22, %s420_s22 }
  0x17   :  { %371 = vmatmul.mubr.msk.f32.vlgmr.msra.gmra.mxu0 %vm43_vm1, %v33_v6  ;;  %384 = vmatprep.subr.mxu0 %v445_v0 }
  0x18   :  { %388 = vmatprep.mubr.msk.f32.mxu0 %vm446_vm0, %v445_v0  ;;  %385 = vmatpush3.msra.mxu0 %v202_v15  ;;  %p427_p8 = por %p426_p7, %p425_p6 }
  0x19   :  { %386 = vmatprep.subr.mxu0 %v445_v0 }
  0x1a   :  { %387 = vmatpush3.msra.mxu0 %v201_v16  ;;  %p428_p9 = pnand %p427_p8, %p421_p5 }
  0xd7   :  { %v113_v11 = vpop.f32.mrf.mxu0 }
  0xd8   :  { %v114_v12 = vadd.f32 %v341_v10, %v113_v11 }
  0xd9   :  { %v372_v13 = vpop.f32.mrf.mxu0 }
  0xda   :  { %v117_v14 = vmax.f32 %v114_v12, 0.0 }
  0xdc   :  { %382 = vmatmul.mubr.msk.f32.vlgmr.msra.gmra.mxu1 %vm43_vm1, %v117_v14 }
 0x19c   :  { %v196_v18 = vpop.f32.mrf.mxu1 }
 0x19d   :  { %v197_v19 = vadd.f32 %v343_v17, %v196_v18 }
 0x19e   :  { %v383_v20 = vpop.f32.mrf.mxu1 }
 0x19f   :  { %v200_v21 = vmax.f32 %v197_v19, 0.0 }
 0x1a1   :  { %389 = vmatmul.mubr.msk.f32.vlgmr.msra.gmra.mxu0 %vm208_vm2, %v200_v21 }
 0x261   :  { %v278_v25 = vpop.f32.mrf.mxu0 }
 0x262   :  { %v279_v26 = vadd.f32 %v345_v24, %v278_v25 }
 0x263   :  { %v390_v27 = vpop.f32.mrf.mxu0 }
 0x264   :  { %v312_v28 = vsel %vm311_vm7, %v279_v26, 0.0  ;;  %v299_v29 = vsel %vm298_vm8, %v279_v26, -1e+30  ;;  %v285_v30 = vsel %vm284_vm9, %v279_v26, -1e+30 }
 0x265   :  { %313 = vadd.xlane.f32.xlu1 %v312_v28  ;;  %300 = vmax.xlane.f32.xlu0 %v299_v29 }
 0x269   :  { %286 = vmax.xlane.f32.xlu0 %v285_v30 }
 0x2ee   :  { %v301_v33 = vpop.xlane.xlu0 %300  ;;  %v314_v40 = vpop.xlane.xlu1 %313 }
 0x2ef   :  { %vm302_vm10 = vcmp.eq.f32.partialorder %v279_v26, %v301_v33  ;;  %v348_v41 = vclamps-f32 %v314_v40, 0.9999999 }
 0x2f0   :  { %vm303_vm11 = vmand %vm298_vm8, %vm302_vm10 }
 0x2f1   :  { %v306_v34 = vsel %vm303_vm11, %v305_v32, 128.0 }
 0x2f2   :  { %307 = vmin.xlane.f32.xlu1 %v306_v34  ;;  %v287_v35 = vpop.xlane.xlu0 %286 }
 0x2f3   :  { %v288_v36 = vsub.f32 %v285_v30, %v287_v35 }
 0x2f5   :  { %v289_v37 = vmul.f32 1.442695, %v288_v36 }
 0x2f7   :  { %396 = vpow2.f32 %v289_v37 }
 0x304   :  { %v397_v38 = vpop.eup %396 }
 0x305   :  { %v291_v39 = vsel %vm284_vm9, %v397_v38, 0.0 }
 0x306   :  { %292 = vadd.xlane.f32.xlu0 %v291_v39 }
 0x37b   :  { %v308_v42 = vpop.xlane.xlu1 %307 }
 0x37c   :  { %v319_v43 = vsel %vm318_vm12, %v308_v42, %v348_v41 }
 0x37d   :  { %321 = vrot.lane.b32.xlu1 %v319_v43, %s447_s3 }
 0x38f   :  { %v293_v44 = vpop.xlane.xlu0 %292 }
 0x390   :  { %398 = vrcp.f32 %v293_v44 }
 0x39d   :  { %v399_v45 = vpop.eup %398 }
 0x39e   :  { %v295_v46 = vmul.f32 %v399_v45, %v291_v39 }
 0x3a0   :  { %317 = vst [vmem:[#allocation5] sm:$0xff] %v295_v46 }
 0x3ef   :  { %v322_v47 = vpop.permute.xlu1 %321 }
 0x3f0   :  { %325 = vst.msk [vmem:[#allocation5] sm:$0xff] %vm324_vm13, %v322_v47 }
 0x3f1   :  { %431 = shalt.err (!%p428_p9)
}
 0x3f2   :  { %335 = dma.vmem_to_hbm [thread:$0]  %s333_s21, 128, %s534_s5, [#allocation4]  }
 0x3f3   :  { %442 = dma.done.wait [#allocation4], 128  }
 0x3f4   :  { %443 = vsyncadd [#allocation4], 4294967168 }
 0x3f5   :  { %339 = vsyncpa [#allocation3], 1 }
 0x3f6   :  { %340 = vsyncpa [#allocation4], 1 }

</bundles_post_ra>
